<compile_context>
chip_gen: v7x
topology: tpu7x:2x2x1
jax: 0.10.0
libtpu: 0.0.40
codegen_flags: <defaults>
</compile_context>

<pallas_src>
import functools

import jax
import jax.numpy as jnp
from jax.experimental import pallas as pl
from jax.experimental.pallas import tpu as pltpu


def _pick_tile_rows(H, W):
    """Smallest divisor TH of H whose output tile is lane-dense (TH*W % 128 == 0)."""
    for th in range(1, H + 1):
        if H % th == 0 and (th * W) % 128 == 0:
            return th
    for th in range(1, H + 1):
        if H % th == 0 and th * W >= 128:
            return th
    return H


def _conv3x3_ps_kernel(x_ref, w_ref, b_ref, m_ref, o_ref, *, W, Cout, S):
    """One (batch, row-tile) grid step.

    x_ref : (1, 1, Cin, S + 2*(W+1))  bf16  flat channel-major band (with halo)
    w_ref : (Cout, 9*Cin)             bf16  im2col-flattened conv weights
    b_ref : (Cout, 1)                 f32   bias
    m_ref : (2, S)                    bf16  row-wrap masks: [w>0, w<W-1]
    o_ref : (1, 1, Cout, S)           f32   conv+bias+ReLU tile (pre pixel-shuffle)
    """
    halo = W + 1
    band = x_ref[0, 0]                      # (Cin, S + 2*halo)
    left_ok = m_ref[0:1, :]                 # (1, S): 1.0 where w   > 0
    right_ok = m_ref[1:2, :]                # (1, S): 1.0 where w+1 < W

    # im2col: 9 static lane-shifted views of the band, edge-masked for the
    # flat-layout row wraparound, stacked along sublanes -> (9*Cin, S).
    slabs = []
    for dh in (-1, 0, 1):
        for dw in (-1, 0, 1):
            s = dh * W + dw
            slab = band[:, halo + s: halo + s + S]       # (Cin, S) static slice
            if dw == -1:
                slab = slab * left_ok
            elif dw == 1:
                slab = slab * right_ok
            slabs.append(slab)
    patches = jnp.concatenate(slabs, axis=0)             # (9*Cin, S) bf16

    # One wide-K MXU matmul, f32 accumulation.
    acc = jnp.dot(w_ref[...], patches,
                  preferred_element_type=jnp.float32)     # (Cout, S) f32
    acc = jnp.maximum(acc + b_ref[...], 0.0)              # bias + ReLU
    o_ref[...] = acc.reshape(1, 1, Cout, S).astype(o_ref.dtype)


def upsampler_forward(x_nchw, w_oihw, bias, scale=2, tile_rows=None):
    """Forward pass of the PyTorch `upsampler` module.

    x_nchw : (N, nFeat, H, W)
    w_oihw : (4*nFeat, nFeat, 3, 3)   PyTorch Conv2d weight layout
    bias   : (4*nFeat,)
    returns: (N, nFeat, scale*H, scale*W)
    """
    N, Cin, H, W = x_nchw.shape
    Cout = w_oihw.shape[0]
    r = scale
    C = Cout // (r * r)

    TH = tile_rows or _pick_tile_rows(H, W)
    T = H // TH
    S = TH * W
    halo = W + 1
    band_len = S + 2 * halo

    # ---- input prep: flatten spatial (free), zero-halo + bf16 cast + band
    # extraction all fuse into one small XLA pass over the (small) input.
    x_flat = x_nchw.reshape(N, Cin, H * W)
    x_pad = jnp.pad(x_flat, ((0, 0), (0, 0), (halo, halo))).astype(jnp.bfloat16)
    x_bands = jnp.stack(
        [x_pad[:, :, t * S: t * S + band_len] for t in range(T)], axis=1
    )                                                     # (N, T, Cin, band_len)

    # ---- weights -> MXU-ready (Cout, 9*Cin), bias -> (Cout, 1); trace-time cheap.
    w2 = jnp.transpose(w_oihw, (0, 2, 3, 1)).reshape(Cout, 9 * Cin)
    w2 = w2.astype(jnp.bfloat16)
    b2 = bias.astype(jnp.float32).reshape(Cout, 1)

    # ---- row-wrap masks (constant, same for every tile since S % W == 0).
    col = jnp.arange(S, dtype=jnp.int32) % W
    masks = jnp.stack(
        [(col > 0), (col < W - 1)], axis=0
    ).astype(jnp.bfloat16)                                # (2, S)

    kernel = functools.partial(_conv3x3_ps_kernel, W=W, Cout=Cout, S=S)

    conv = pl.pallas_call(
        kernel,
        out_shape=jax.ShapeDtypeStruct((N, T, Cout, S), jnp.float32),
        grid_spec=pltpu.PrefetchScalarGridSpec(
            num_scalar_prefetch=0,
            grid=(N, T),
            in_specs=[
                pl.BlockSpec((1, 1, Cin, band_len), lambda n, t: (n, t, 0, 0)),
                pl.BlockSpec((Cout, 9 * Cin), lambda n, t: (0, 0)),
                pl.BlockSpec((Cout, 1), lambda n, t: (0, 0)),
                pl.BlockSpec((2, S), lambda n, t: (0, 0)),
            ],
            out_specs=pl.BlockSpec((1, 1, Cout, S), lambda n, t: (n, t, 0, 0)),
        ),
        compiler_params=pltpu.CompilerParams(
            dimension_semantics=("parallel", "parallel"),
            # Modest, generation-safe cap (>= defaults everywhere, < v7x physical).
            vmem_limit_bytes=48 * 1024 * 1024,
        ),
    )(x_bands, w2, b2, masks)                             # (N, T, Cout, S) f32

    # ---- pixel shuffle + channel-major -> NCHW in ONE fused transpose pass.
    # conv[n, t, c*r*r + i*r + j, th*W + w] -> out[n, c, (t*TH+th)*r + i, w*r + j]
    y = conv.reshape(N, T, C, r, r, TH, W)
    y = jnp.transpose(y, (0, 2, 1, 5, 3, 6, 4))           # (N, C, T, TH, r, W, r)
    out = y.reshape(N, C, H * r, W * r)
    return out.astype(x_nchw.dtype)


def _reference_forward(x_nchw, w_oihw, bias, scale=2):
    """Pure-JAX f32 reference (lax conv) for the correctness check."""
    y = jax.lax.conv_general_dilated(
        x_nchw, w_oihw, window_strides=(1, 1), padding=((1, 1), (1, 1)),
        dimension_numbers=("NCHW", "OIHW", "NCHW"))
    y = y + bias.reshape(1, -1, 1, 1)
    N, Crr, H, W = y.shape
    C = Crr // (scale * scale)
    y = y.reshape(N, C, scale, scale, H, W)
    y = jnp.transpose(y, (0, 1, 4, 2, 5, 3)).reshape(N, C, H * scale, W * scale)
    return jnp.maximum(y, 0.0)


if __name__ == "__main__":
    nFeat, scale = 16, 2
    N, H, W = 2, 16, 16

    key = jax.random.PRNGKey(0)
    k_x, k_w, k_b = jax.random.split(key, 3)

    x = jax.random.normal(k_x, (N, nFeat, H, W), dtype=jnp.float32)
    # Deterministic synthetic params (shapes match nn.Conv2d(nFeat, 4*nFeat, 3)).
    fan_in = nFeat * 3 * 3
    bound = 1.0 / (fan_in ** 0.5)
    w = jax.random.uniform(k_w, (4 * nFeat, nFeat, 3, 3),
                           minval=-bound, maxval=bound, dtype=jnp.float32)
    b = jax.random.uniform(k_b, (4 * nFeat,),
                           minval=-bound, maxval=bound, dtype=jnp.float32)

    out = jax.jit(upsampler_forward)(x, w, b)
    out = jax.block_until_ready(out)

    ref = _reference_forward(x, w, b)
    assert out.shape == (N, nFeat, scale * H, scale * W), out.shape
    # bf16 MXU inputs with f32 accumulation -> loosened tolerance vs f32 reference.
    max_err = float(jnp.max(jnp.abs(out - ref)))
    assert max_err < 5e-2, f"mismatch vs reference, max abs err = {max_err}"

    print("KERNEL_OK")
</pallas_src>

<mosaic_0001>
module attributes {stable_mosaic.version = 11 : i64} {
  func.func @_conv3x3_ps_kernel(%arg0: i32, %arg1: i32, %arg2: memref<1x1x16x162xbf16, #tpu.memory_space<vmem>>, %arg3: memref<64x144xbf16, #tpu.memory_space<vmem>>, %arg4: memref<64x1xf32, #tpu.memory_space<vmem>>, %arg5: memref<2x128xbf16, #tpu.memory_space<vmem>>, %arg6: memref<1x1x64x128xf32, #tpu.memory_space<vmem>>) attributes {dimension_semantics = [#tpu.dimension_semantics<parallel>, #tpu.dimension_semantics<parallel>], iteration_bounds = array<i64: 2, 2>, scalar_prefetch = 0 : i64, scratch_operands = 0 : i64, tpu.core_type = #tpu.core_type<tc>, window_params = [{transform_indices = @transform_0, window_bounds = array<i64: 1, 1, 16, 162>}, {pipeline_mode = #tpu.pipeline_mode<synchronous>, transform_indices = @transform_1, window_bounds = array<i64: 64, 144>}, {pipeline_mode = #tpu.pipeline_mode<synchronous>, transform_indices = @transform_2, window_bounds = array<i64: 64, 1>}, {pipeline_mode = #tpu.pipeline_mode<synchronous>, transform_indices = @transform_3, window_bounds = array<i64: 2, 128>}, {transform_indices = @transform_4, window_bounds = array<i64: 1, 1, 64, 128>}]} {
    %c0 = arith.constant 0 : index
    %c0_0 = arith.constant 0 : index
    %c0_1 = arith.constant 0 : index
    %c0_2 = arith.constant 0 : index
    %0 = vector.load %arg2[%c0, %c0_0, %c0_1, %c0_2] : memref<1x1x16x162xbf16, #tpu.memory_space<vmem>>, vector<1x1x16x162xbf16>
    %1 = vector.shape_cast %0 : vector<1x1x16x162xbf16> to vector<16x162xbf16>
    %c0_3 = arith.constant 0 : index
    %c0_4 = arith.constant 0 : index
    %2 = vector.load %arg5[%c0_3, %c0_4] : memref<2x128xbf16, #tpu.memory_space<vmem>>, vector<1x128xbf16>
    %c1 = arith.constant 1 : index
    %c0_5 = arith.constant 0 : index
    %3 = vector.load %arg5[%c1, %c0_5] : memref<2x128xbf16, #tpu.memory_space<vmem>>, vector<1x128xbf16>
    %4 = vector.extract_strided_slice %1 {offsets = [0, 0], sizes = [16, 128], strides = [1, 1]} : vector<16x162xbf16> to vector<16x128xbf16>
    %5 = vector.broadcast %2 : vector<1x128xbf16> to vector<16x128xbf16>
    %6 = arith.mulf %4, %5 : vector<16x128xbf16>
    %7 = vector.extract_strided_slice %1 {offsets = [0, 1], sizes = [16, 128], strides = [1, 1]} : vector<16x162xbf16> to vector<16x128xbf16>
    %8 = vector.extract_strided_slice %1 {offsets = [0, 2], sizes = [16, 128], strides = [1, 1]} : vector<16x162xbf16> to vector<16x128xbf16>
    %9 = vector.broadcast %3 : vector<1x128xbf16> to vector<16x128xbf16>
    %10 = arith.mulf %8, %9 : vector<16x128xbf16>
    %11 = vector.extract_strided_slice %1 {offsets = [0, 16], sizes = [16, 128], strides = [1, 1]} : vector<16x162xbf16> to vector<16x128xbf16>
    %12 = vector.broadcast %2 : vector<1x128xbf16> to vector<16x128xbf16>
    %13 = arith.mulf %11, %12 : vector<16x128xbf16>
    %14 = vector.extract_strided_slice %1 {offsets = [0, 17], sizes = [16, 128], strides = [1, 1]} : vector<16x162xbf16> to vector<16x128xbf16>
    %15 = vector.extract_strided_slice %1 {offsets = [0, 18], sizes = [16, 128], strides = [1, 1]} : vector<16x162xbf16> to vector<16x128xbf16>
    %16 = vector.broadcast %3 : vector<1x128xbf16> to vector<16x128xbf16>
    %17 = arith.mulf %15, %16 : vector<16x128xbf16>
    %18 = vector.extract_strided_slice %1 {offsets = [0, 32], sizes = [16, 128], strides = [1, 1]} : vector<16x162xbf16> to vector<16x128xbf16>
    %19 = vector.broadcast %2 : vector<1x128xbf16> to vector<16x128xbf16>
    %20 = arith.mulf %18, %19 : vector<16x128xbf16>
    %21 = vector.extract_strided_slice %1 {offsets = [0, 33], sizes = [16, 128], strides = [1, 1]} : vector<16x162xbf16> to vector<16x128xbf16>
    %22 = vector.extract_strided_slice %1 {offsets = [0, 34], sizes = [16, 128], strides = [1, 1]} : vector<16x162xbf16> to vector<16x128xbf16>
    %23 = vector.broadcast %3 : vector<1x128xbf16> to vector<16x128xbf16>
    %24 = arith.mulf %22, %23 : vector<16x128xbf16>
    %25 = tpu.concatenate %6, %7, %10, %13, %14, %17, %20, %21, %24 in 0 : vector<16x128xbf16>, vector<16x128xbf16>, vector<16x128xbf16>, vector<16x128xbf16>, vector<16x128xbf16>, vector<16x128xbf16>, vector<16x128xbf16>, vector<16x128xbf16>, vector<16x128xbf16> -> vector<144x128xbf16>
    %c0_6 = arith.constant 0 : index
    %c0_7 = arith.constant 0 : index
    %26 = vector.load %arg3[%c0_6, %c0_7] : memref<64x144xbf16, #tpu.memory_space<vmem>>, vector<64x144xbf16>
    %cst = arith.constant dense<0.000000e+00> : vector<64x128xf32>
    %27 = tpu.matmul %26, %25, %cst {dimension_numbers = #tpu.dot_dimension_numbers<[1], [0], [0], [1], [0, 0, 1, 1], [], []>} : vector<64x144xbf16>, vector<144x128xbf16>, vector<64x128xf32> -> vector<64x128xf32>
    %c0_8 = arith.constant 0 : index
    %c0_9 = arith.constant 0 : index
    %28 = vector.load %arg4[%c0_8, %c0_9] : memref<64x1xf32, #tpu.memory_space<vmem>>, vector<64x1xf32>
    %29 = vector.broadcast %28 : vector<64x1xf32> to vector<64x128xf32>
    %30 = arith.addf %27, %29 : vector<64x128xf32>
    %cst_10 = arith.constant 0.000000e+00 : f32
    %31 = vector.broadcast %cst_10 : f32 to vector<64x128xf32>
    %32 = arith.maximumf %30, %31 : vector<64x128xf32>
    %33 = vector.shape_cast %32 : vector<64x128xf32> to vector<1x1x64x128xf32>
    %c0_11 = arith.constant 0 : index
    %c0_12 = arith.constant 0 : index
    %c0_13 = arith.constant 0 : index
    %c0_14 = arith.constant 0 : index
    %34 = vector.load %arg6[%c0_11, %c0_12, %c0_13, %c0_14] : memref<1x1x64x128xf32, #tpu.memory_space<vmem>>, vector<1x1x64x128xf32>
    tpu.vector_store %arg6[%c0_11, %c0_12, %c0_13, %c0_14], %33 {strides = array<i32>} : memref<1x1x64x128xf32, #tpu.memory_space<vmem>>, vector<1x1x64x128xf32>,
    return
  }
  func.func @transform_0(%arg0: i32, %arg1: i32) -> (i32, i32, i32, i32) {
    %c0_i32 = arith.constant 0 : i32
    %c0_i32_0 = arith.constant 0 : i32
    %c0_i32_1 = arith.constant 0 : i32
    return %arg0, %arg1, %c0_i32, %c0_i32_0 : i32, i32, i32, i32
  }
  func.func @transform_1(%arg0: i32, %arg1: i32) -> (i32, i32) {
    %c0_i32 = arith.constant 0 : i32
    %c0_i32_0 = arith.constant 0 : i32
    %c0_i32_1 = arith.constant 0 : i32
    return %c0_i32, %c0_i32_0 : i32, i32
  }
  func.func @transform_2(%arg0: i32, %arg1: i32) -> (i32, i32) {
    %c0_i32 = arith.constant 0 : i32
    %c0_i32_0 = arith.constant 0 : i32
    %c0_i32_1 = arith.constant 0 : i32
    return %c0_i32, %c0_i32_0 : i32, i32
  }
  func.func @transform_3(%arg0: i32, %arg1: i32) -> (i32, i32) {
    %c0_i32 = arith.constant 0 : i32
    %c0_i32_0 = arith.constant 0 : i32
    %c0_i32_1 = arith.constant 0 : i32
    return %c0_i32, %c0_i32_0 : i32, i32
  }
  func.func @transform_4(%arg0: i32, %arg1: i32) -> (i32, i32, i32, i32) {
    %c0_i32 = arith.constant 0 : i32
    %c0_i32_0 = arith.constant 0 : i32
    %c0_i32_1 = arith.constant 0 : i32
    return %arg0, %arg1, %c0_i32, %c0_i32_0 : i32, i32, i32, i32
  }
}

</mosaic_0001>

<bundles_post_ra>
// kernel: upsampler_forward.1
= control target key start
LH: loop header
LB: loop body
LE: loop exit
PB: predicated region body
PF: predicated region fallthrough
CT: control target
= control target key end

     0   :  { %s899_s15 = smov 0   ;;  %s901_s16 = smov 0   ;;  %s1074_s0 = inlined_call_operand.vmem [shape: bf16[2,2,16,162], index: 0, kind: input, shape index: {}]   ;;  %s1075_s1 = inlined_call_operand.vmem [shape: bf16[64,144], index: 1, kind: input, shape index: {}]   ;;  %s1076_s2 = inlined_call_operand.vmem [shape: f32[64,1], index: 2, kind: input, shape index: {}]   ;;  %s1077_s3 = inlined_call_operand.vmem [shape: bf16[2,128], index: 3, kind: input, shape index: {}]   ;;  %s1078_s4 = inlined_call_operand.vmem [shape: f32[2,2,64,128], index: 4, kind: output, shape index: {}]  }
   0x1   :  { %s903_s17 = smov 0   ;;  %s905_s18 = smov 0  }
   0x2   :  { %s907_s19 = smov 0  }
   0x3 LB: > { %s23_s20 = sadd.s32 1, %s850_s17  ;;  %s26_s21 = sadd.s32 1, %s854_s18  ;;  %s858_s19 = sphi %s907_s19, %s14_s19   ;;  %s854_s18 = sphi %s905_s18, %s1082_s18   ;;  %s850_s17 = sphi %s903_s17, %s1081_s17   ;;  %s846_s16 = sphi %s901_s16, %s1080_s16   ;;  %s842_s15 = sphi %s899_s15, %s1079_s15  }
   0x4   : > { %p24_p0 = scmp.ge.s32.totalorder %s23_s20, 2  ;;  %p696_p1 = scmp.ge.s32.totalorder %s858_s19, 1 }
   0x5   : > { %p182_p2 = scmp.lt.s32.totalorder %s858_s19, 5 }
   0x6   : > { %s1084_s20 = smov (%p24_p0, %s23_s20), 0  ;;  %s1086_s21 = smov (!%p24_p0, %s26_s21), %s854_s18 }
   0x7   : > { %p183_p3 = pnand %p696_p1, %p182_p2  ;;  %p28_p4 = scmp.ge.s32.totalorder %s1086_s21, 2 }
   0x8   : > { %v237_v0 = vld [vmem:[%s1077_s3] sm:$0x1] (!%p183_p3)  ;;  %v241_v1 = vlaneseq (!%p183_p3)  ;;  %p216_p5 = scmp.lt.s32.totalorder (!%p183_p3), %s846_s16, 1  ;;  %p218_p6 = scmp.lt.s32.totalorder (!%p183_p3), %s842_s15, 1  ;;  %v866_v17 = vmov (!%p183_p3), 0   ;;  %vm264_vm0 = vcmask (!%p183_p3), 15360  }
   0x9   : > { %s1088_s21 = smov (%p28_p4, %s1086_s21), 0  ;;  %186 = sbr.rel (%p183_p3) target bundleno = 510 (0x1fe), region = 36 }
   0xa   : > { %v251_v2 = vshrl.u32 (!%p183_p3), %v237_v0, 16  ;;  %v242_v3 = vshrl.u32 (!%p183_p3), %v241_v1, 7  ;;  %v239_v4 = vpack.i.b16 (!%p183_p3), %v237_v0, %v237_v0  ;;  %s860_s28 = smov (!%p183_p3), 2   ;;  %s861_s29 = smov (!%p183_p3), 18   ;;  %516 = vmatprep.subr.bf16.mxu0 (!%p183_p3), %v866_v17  ;;  %732 = vmatprep.subr.bf16.mxu1 (!%p183_p3), %v866_v17  ;;  %vm272_vm1 = vcmask (!%p183_p3), 130048   ;;  %v419_v59 = vld [vmem:[%s1076_s2] sm:$0xff] (!%p183_p3) }
   0xb   : > { %s862_s7 = smov (!%p183_p3), 16   ;;  %s863_s8 = smov (!%p183_p3), 32   ;;  %804 = vset.pattern.permute.xlu1 (!%p183_p3), %v866_v17  ;;  %805 = vset.pattern.permute.xlu0 (!%p183_p3), %v866_v17  ;;  %vm280_vm2 = vcmask (!%p183_p3), 146432   ;;  %vm319_vm3 = vcmask (!%p183_p3), 1039360   ;;  %vm288_vm4 = vcmask (!%p183_p3), 261120   ;;  %vm296_vm5 = vcmask (!%p183_p3), 277504  }
   0xc   : > { %v252_v5 = vpack.i.b16 (!%p183_p3), %v251_v2, %v251_v2  ;;  %v243_v6 = vsub.s32 (!%p183_p3), 0, %v242_v3  ;;  %s864_s9 = smov (!%p183_p3), 34   ;;  %s865_s10 = smov (!%p183_p3), 127   ;;  %v810_v50 = vld [vmem:[%s1075_s1 + $0x4] ss:$8 sps:$4 sm:$0xff] (!%p183_p3)   ;;  %v421_v61 = vld [vmem:[%s1076_s2 + $0x10] sm:$0xff] (!%p183_p3) }
   0xd   : > { %s867_s11 = smov (!%p183_p3), 126   ;;  %s868_s12 = smov (!%p183_p3), 112   ;;  %v813_v51 = vld [vmem:[%s1075_s1 + $0x24] ss:$8 sps:$4 sm:$0xff] (!%p183_p3)   ;;  %726 = vmatprep.mubr.msk.bf16.mxu0 (!%p183_p3), %vm272_vm1, %v810_v50  ;;  %v422_v63 = vld [vmem:[%s1076_s2 + $0x18] sm:$0xff] (!%p183_p3)  ;;  %v425_v0 = vld [vmem:[%s1076_s2 + $0x30] sm:$0xff] (!%p183_p3) }
   0xe   : > { %v257_v7 = vrot.slane (!%p183_p3), %v252_v5, %v243_v6  ;;  %v244_v8 = vrot.slane (!%p183_p3), %v239_v4, %v243_v6  ;;  %s869_s13 = smov (!%p183_p3), 111   ;;  %s870_s14 = smov (!%p183_p3), 110   ;;  %728 = vmatprep.mubr.msk.bf16.mxu1 (!%p183_p3), %vm272_vm1, %v813_v51  ;;  %v420_v60 = vld [vmem:[%s1076_s2 + $0x8] sm:$0xff] (!%p183_p3)  ;;  %v423_v62 = vld [vmem:[%s1076_s2 + $0x20] sm:$0xff] (!%p183_p3)  ;;  %v426_v2 = vld [vmem:[%s1076_s2 + $0x38] sm:$0xff] (!%p183_p3)  ;;  %vm334_vm6 = vcmask (!%p183_p3), 1031168  }
   0xf   : > { %v424_v1 = vld [vmem:[%s1076_s2 + $0x28] sm:$0xff] (!%p183_p3)  ;;  %vm349_vm7 = vcmask (!%p183_p3), 916480   ;;  %vm356_vm8 = vcmask (!%p183_p3), 908288   ;;  %vm371_vm9 = vcmask (!%p183_p3), 900096   ;;  %vm386_vm10 = vcmask (!%p183_p3), 785408  }
  0x10   : > { %s1090_s16 = smov (!%p216_p5, %s846_s16), 1  ;;  %s1092_s15 = smov (!%p218_p6, %s842_s15), 1  ;;  %v704_v9 = vcombine.low %v257_v7, %v257_v7  ;;  %v703_v10 = vcombine.low %v244_v8, %v244_v8  ;;  %vm393_vm11 = vcmask 777216   ;;  %vm408_vm12 = vcmask 769024  }
  0x11   : > { %s698_s24 = sshll.u32 %s1090_s16, 3  ;;  %s697_s25 = sshll.u32 %s1092_s15, 2 }
  0x12   : > { %s222_s26 = sadd.s32 %s698_s24, %s697_s25  ;;  %261 = vrot.lane.b32.xlu0 %v704_v9, %s860_s28  ;;  %277 = vrot.lane.b32.xlu1 %v704_v9, %s861_s29  ;;  %s873_s28 = smov 94  }
  0x13   : > { %s699_s27 = sshll.u32 %s222_s26, 2  ;;  %s871_s26 = smov 96  }
  0x14   : > { %s224_s6 = scalar_lea.vmem %s1074_s0, %s699_s27  ;;  %s872_s27 = smov 95  }
  0x15   : > { %v941_v11 = vld [vmem:[%s224_s6] sm:$0xff]  ;;  %v943_v12 = vld [vmem:[%s224_s6 + $0x8] sm:$0xff] }
  0x16   : > { %269 = vrot.lane.b32.xlu0 %v703_v10, %s862_s7  ;;  %285 = vrot.lane.b32.xlu1 %v703_v10, %s863_s8  ;;  %v947_v13 = vcombine.low %v941_v11, %v943_v12  ;;  %v951_v14 = vcombine.high %v941_v11, %v943_v12  ;;  %v249_v15 = vmul.bf16 %v703_v10, %v941_v11 }
  0x17   : > { %v250_v16 = vmul.bf16 %v703_v10, %v943_v12 }
  0x19   : > { %v705_v18 = vcombine.low %v249_v15, %v250_v16 }
  0x1a   : > { %293 = vrot.lane.b32.xlu0 %v704_v9, %s864_s9  ;;  %315 = vrot.lane.b32.xlu1 %v947_v13, %s865_s10 }
  0x1b   : > { %517 = vmatpush1.bf16.msra.mxu0 %v705_v18  ;;  %741 = vmatpush1.bf16.msra.mxu1 %v705_v18 }
  0x1c   : > { %518 = vmatprep.subr.bf16.mxu0 %v866_v17  ;;  %733 = vmatprep.subr.bf16.mxu1 %v866_v17 }
  0x1e   : > { %317 = vrot.lane.b32.xlu0 %v951_v14, %s865_s10 }
  0x84   : > { %v262_v19 = vpop.permute.xlu0 %261  ;;  %v278_v20 = vpop.permute.xlu1 %277 }
  0x85   : > { %v263_v21 = vrot.slane %v262_v19, 4  ;;  %v279_v31 = vrot.slane %v278_v20, 4 }
  0x87   : > { %v265_v22 = vsel %vm264_vm0, %v263_v21, %v262_v19  ;;  %v281_v38 = vsel %vm280_vm2, %v279_v31, %v278_v20 }
  0x88   : > { %v267_v23 = vmul.bf16 %v265_v22, %v941_v11  ;;  %v268_v24 = vmul.bf16 %v265_v22, %v943_v12  ;;  %v270_v25 = vpop.permute.xlu0 %269  ;;  %v286_v29 = vpop.permute.xlu1 %285  ;;  %v283_v42 = vmul.bf16 %v281_v38, %v941_v11  ;;  %v284_v43 = vmul.bf16 %v281_v38, %v943_v12 }
  0x89   : > { %v271_v26 = vrot.slane %v270_v25, 4  ;;  %v287_v39 = vrot.slane %v286_v29, 4 }
  0x8a   : > { %v709_v27 = vcombine.high %v267_v23, %v268_v24  ;;  %v708_v28 = vcombine.low %v267_v23, %v268_v24  ;;  %v713_v47 = vcombine.high %v283_v42, %v284_v43  ;;  %v712_v48 = vcombine.low %v283_v42, %v284_v43 }
  0x8b   : > { %v273_v30 = vsel %vm272_vm1, %v271_v26, %v270_v25  ;;  %v289_v44 = vsel %vm288_vm4, %v287_v39, %v286_v29  ;;  %v808_v25 = vld [vmem:[%s1075_s1] ss:$8 sps:$4 sm:$0xff]   ;;  %v819_v29 = vld [vmem:[%s1075_s1 + $0x30] ss:$8 sps:$4 sm:$0xff]  }
  0x8c   : > { %v275_v32 = vmul.bf16 %v273_v30, %v941_v11  ;;  %v276_v33 = vmul.bf16 %v273_v30, %v943_v12  ;;  %332 = vrot.lane.b32.xlu0 %v709_v27, %s867_s11  ;;  %330 = vrot.lane.b32.xlu1 %v708_v28, %s867_s11  ;;  %v294_v34 = vpop.permute.xlu0 %293  ;;  %v316_v37 = vpop.permute.xlu1 %315  ;;  %v291_v45 = vmul.bf16 %v289_v44, %v941_v11  ;;  %v811_v26 = vld [vmem:[%s1075_s1 + $0x20] ss:$8 sps:$4 sm:$0xff]   ;;  %v814_v27 = vld [vmem:[%s1075_s1 + $0x14] ss:$8 sps:$4 sm:$0xff]  }
  0x8d   : > { %v292_v46 = vmul.bf16 %v289_v44, %v943_v12  ;;  %v295_v49 = vrot.slane %v294_v34, 4  ;;  %v818_v28 = vld [vmem:[%s1075_s1 + $0x10] ss:$8 sps:$4 sm:$0xff]  }
  0x8e   : > { %v711_v35 = vcombine.high %v275_v32, %v276_v33  ;;  %v710_v36 = vcombine.low %v275_v32, %v276_v33 }
  0x8f   : > { %v715_v52 = vcombine.high %v291_v45, %v292_v46  ;;  %v714_v53 = vcombine.low %v291_v45, %v292_v46  ;;  %v297_v54 = vsel %vm296_vm5, %v295_v49, %v294_v34 }
  0x90   : > { %347 = vrot.lane.b32.xlu0 %v711_v35, %s868_s12  ;;  %345 = vrot.lane.b32.xlu1 %v710_v36, %s868_s12  ;;  %v318_v40 = vpop.permute.xlu0 %317  ;;  %v299_v55 = vmul.bf16 %v297_v54, %v941_v11  ;;  %v300_v56 = vmul.bf16 %v297_v54, %v943_v12  ;;  %s700_s12 = sshll.u32 %s1092_s15, 3 }
  0x91   : > { %v320_v41 = vsel %vm319_vm3, %v316_v37, %v318_v40 }
  0x92   : > { %519 = vmatpush1.bf16.msra.mxu0 %v320_v41  ;;  %742 = vmatpush1.bf16.msra.mxu1 %v320_v41  ;;  %v717_v57 = vcombine.high %v299_v55, %v300_v56  ;;  %v716_v58 = vcombine.low %v299_v55, %v300_v56 }
  0x93   : > { %520 = vmatprep.subr.bf16.mxu0 %v866_v17  ;;  %734 = vmatprep.subr.bf16.mxu1 %v866_v17 }
  0x94   : > { %354 = vrot.lane.b32.xlu0 %v951_v14, %s869_s13  ;;  %352 = vrot.lane.b32.xlu1 %v947_v13, %s869_s13  ;;  %s701_s13 = sshll.u32 %s1090_s16, 4 }
  0x98   : > { %369 = vrot.lane.b32.xlu0 %v713_v47, %s870_s14  ;;  %367 = vrot.lane.b32.xlu1 %v712_v48, %s870_s14  ;;  %s231_s14 = sadd.s32 %s701_s13, %s700_s12 }
  0x99   : > { %s702_s22 = sshll.u32 %s231_s14, 3 }
  0x9a   : > { %s1049_s25 = scalar_lea.vmem %s1078_s4, %s702_s22 }
  0x9c   : > { %384 = vrot.lane.b32.xlu0 %v715_v52, %s871_s26  ;;  %382 = vrot.lane.b32.xlu1 %v714_v53, %s871_s26 }
  0xa0   : > { %391 = vrot.lane.b32.xlu0 %v951_v14, %s872_s27  ;;  %389 = vrot.lane.b32.xlu1 %v947_v13, %s872_s27 }
  0xa4   : > { %406 = vrot.lane.b32.xlu0 %v717_v57, %s873_s28  ;;  %404 = vrot.lane.b32.xlu1 %v716_v58, %s873_s28 }
  0xa8   : > { %429 = vperm.xlu1 %804, %v419_v59   ;;  %434 = vperm.xlu0 %805, %v420_v60  }
  0xac   : > { %439 = vperm.xlu1 %804, %v421_v61   ;;  %449 = vperm.xlu0 %805, %v423_v62  }
  0xb0   : > { %444 = vperm.xlu1 %804, %v422_v63   ;;  %459 = vperm.xlu0 %805, %v425_v0  }
  0xb4   : > { %454 = vperm.xlu1 %804, %v424_v1  }
  0xb8   : > { %464 = vperm.xlu1 %804, %v426_v2  }
  0xfe   : > { %v333_v3 = vpop.permute.xlu0 %332  ;;  %v331_v4 = vpop.permute.xlu1 %330 }
  0xff   : > { %v335_v5 = vsel %vm334_vm6, %v331_v4, %v333_v3 }
 0x100   : > { %521 = vmatpush1.bf16.msra.mxu0 %v335_v5  ;;  %743 = vmatpush1.bf16.msra.mxu1 %v335_v5 }
 0x101   : > { %522 = vmatprep.subr.bf16.mxu0 %v866_v17  ;;  %735 = vmatprep.subr.bf16.mxu1 %v866_v17 }
 0x102   : > { %v348_v6 = vpop.permute.xlu0 %347  ;;  %v346_v7 = vpop.permute.xlu1 %345 }
 0x103   : > { %v350_v8 = vsel %vm349_vm7, %v346_v7, %v348_v6 }
 0x104   : > { %523 = vmatpush1.bf16.msra.mxu0 %v350_v8  ;;  %744 = vmatpush1.bf16.msra.mxu1 %v350_v8 }
 0x105   : > { %524 = vmatprep.subr.bf16.mxu0 %v866_v17  ;;  %736 = vmatprep.subr.bf16.mxu1 %v866_v17 }
 0x106   : > { %v355_v9 = vpop.permute.xlu0 %354  ;;  %v353_v10 = vpop.permute.xlu1 %352 }
 0x107   : > { %v357_v11 = vsel %vm356_vm8, %v353_v10, %v355_v9 }
 0x108   : > { %525 = vmatpush1.bf16.msra.mxu0 %v357_v11  ;;  %745 = vmatpush1.bf16.msra.mxu1 %v357_v11 }
 0x109   : > { %526 = vmatprep.subr.bf16.mxu0 %v866_v17  ;;  %737 = vmatprep.subr.bf16.mxu1 %v866_v17 }
 0x10a   : > { %v370_v12 = vpop.permute.xlu0 %369  ;;  %v368_v13 = vpop.permute.xlu1 %367 }
 0x10b   : > { %v372_v14 = vsel %vm371_vm9, %v368_v13, %v370_v12 }
 0x10c   : > { %527 = vmatpush1.bf16.msra.mxu0 %v372_v14  ;;  %746 = vmatpush1.bf16.msra.mxu1 %v372_v14 }
 0x10d   : > { %528 = vmatprep.subr.bf16.mxu0 %v866_v17  ;;  %738 = vmatprep.subr.bf16.mxu1 %v866_v17 }
 0x10e   : > { %v385_v15 = vpop.permute.xlu0 %384  ;;  %v383_v16 = vpop.permute.xlu1 %382 }
 0x10f   : > { %v387_v18 = vsel %vm386_vm10, %v383_v16, %v385_v15 }
 0x110   : > { %529 = vmatpush1.bf16.msra.mxu0 %v387_v18  ;;  %747 = vmatpush1.bf16.msra.mxu1 %v387_v18 }
 0x111   : > { %530 = vmatprep.subr.bf16.mxu0 %v866_v17  ;;  %739 = vmatprep.subr.bf16.mxu1 %v866_v17 }
 0x112   : > { %v392_v19 = vpop.permute.xlu0 %391  ;;  %v390_v20 = vpop.permute.xlu1 %389 }
 0x113   : > { %v394_v21 = vsel %vm393_vm11, %v390_v20, %v392_v19 }
 0x114   : > { %531 = vmatpush1.bf16.msra.mxu0 %v394_v21  ;;  %748 = vmatpush1.bf16.msra.mxu1 %v394_v21 }
 0x115   : > { %532 = vmatprep.subr.bf16.mxu0 %v866_v17  ;;  %740 = vmatprep.subr.bf16.mxu1 %v866_v17  ;;  %v816_v17 = vld [vmem:[%s1075_s1 + $0x34] ss:$8 sps:$4 sm:$0xff]  }
 0x116   : > { %v407_v22 = vpop.permute.xlu0 %406  ;;  %v405_v23 = vpop.permute.xlu1 %404 }
 0x117   : > { %v409_v24 = vsel %vm408_vm12, %v405_v23, %v407_v22 }
 0x118   : > { %533 = vmatpush1.bf16.msra.mxu0 %v409_v24  ;;  %749 = vmatpush1.bf16.msra.mxu1 %v409_v24 }
 0x11b   : > { %549 = vmatmul.mubr.bf16.vlgmr.msra.gmra.mrb[0].mxu0 %v808_v25  ;;  %565 = vmatmul.mubr.bf16.vlgmr.msra.gmra.mrb[0].mxu1 %v811_v26 }
 0x11c   : > { %727 = vmatprep.mubr.msk.bf16.mxu0 %vm272_vm1, %v814_v27  ;;  %729 = vmatprep.mubr.msk.bf16.mxu1 %vm272_vm1, %v816_v17 }
 0x123   : > { %557 = vmatmul.mubr.bf16.gmra.mrb[4].mxu0 %v818_v28  ;;  %573 = vmatmul.mubr.bf16.gmra.mrb[4].mxu1 %v819_v29 }
 0x127   : > { %v430_v30 = vpop.permute.xlu1 %429  ;;  %v435_v33 = vpop.permute.xlu0 %434 }
 0x12b   : > { %v440_v31 = vpop.permute.xlu1 %439  ;;  %v450_v35 = vpop.permute.xlu0 %449 }
 0x12f   : > { %v445_v32 = vpop.permute.xlu1 %444  ;;  %v460_v53 = vpop.permute.xlu0 %459 }
 0x133   : > { %v455_v34 = vpop.permute.xlu1 %454 }
 0x137   : > { %v465_v52 = vpop.permute.xlu1 %464 }
 0x1ee   : > { %v550_v36 = vpop.f32.mrb[0].mxu0  ;;  %v566_v37 = vpop.f32.mrb[0].mxu1 }
 0x1ef   : > { %v551_v38 = vadd.f32 %v550_v36, %v430_v30  ;;  %v567_v39 = vadd.f32 %v566_v37, %v450_v35  ;;  %v552_v40 = vpop.f32.mrb[1].mxu0  ;;  %v568_v41 = vpop.f32.mrb[1].mxu1 }
 0x1f0   : > { %v553_v42 = vpop.f32.mrb[2].mxu0  ;;  %v569_v43 = vpop.f32.mrb[2].mxu1 }
 0x1f1   : > { %v581_v44 = vmax.f32 %v551_v38, 0.0  ;;  %v585_v45 = vmax.f32 %v567_v39, 0.0  ;;  %v554_v46 = vadd.f32 %v553_v42, %v435_v33  ;;  %v570_v47 = vadd.f32 %v569_v43, %v455_v34  ;;  %v555_v48 = vpop.f32.mrb[3].mxu0  ;;  %v571_v49 = vpop.f32.mrb[3].mxu1 }
 0x1f3   : > { %589 = vst [vmem:[%s1049_s25] sm:$0xff] %v581_v44  ;;  %593 = vst [vmem:[%s1049_s25 + $0x20] sm:$0xff] %v585_v45  ;;  %v582_v50 = vmax.f32 %v554_v46, 0.0  ;;  %v586_v51 = vmax.f32 %v570_v47, 0.0 }
 0x1f5   : > { %590 = vst [vmem:[%s1049_s25 + $0x8] sm:$0xff] %v582_v50  ;;  %594 = vst [vmem:[%s1049_s25 + $0x28] sm:$0xff] %v586_v51 }
 0x1f6   : > { %v558_v54 = vpop.f32.mrb[4].mxu0  ;;  %v574_v55 = vpop.f32.mrb[4].mxu1 }
 0x1f7   : > { %v559_v56 = vadd.f32 %v558_v54, %v440_v31  ;;  %v575_v57 = vadd.f32 %v574_v55, %v460_v53  ;;  %v560_v58 = vpop.f32.mrb[5].mxu0  ;;  %v576_v59 = vpop.f32.mrb[5].mxu1 }
 0x1f8   : > { %v561_v60 = vpop.f32.mrb[6].mxu0  ;;  %v577_v61 = vpop.f32.mrb[6].mxu1 }
 0x1f9   : > { %v583_v62 = vmax.f32 %v559_v56, 0.0  ;;  %v587_v63 = vmax.f32 %v575_v57, 0.0  ;;  %v562_v0 = vadd.f32 %v561_v60, %v445_v32  ;;  %v578_v1 = vadd.f32 %v577_v61, %v465_v52  ;;  %v563_v2 = vpop.f32.mrb[7].mxu0  ;;  %v579_v3 = vpop.f32.mrb[7].mxu1 }
 0x1fb   : > { %591 = vst [vmem:[%s1049_s25 + $0x10] sm:$0xff] %v583_v62  ;;  %595 = vst [vmem:[%s1049_s25 + $0x30] sm:$0xff] %v587_v63  ;;  %v584_v4 = vmax.f32 %v562_v0, 0.0  ;;  %v588_v5 = vmax.f32 %v578_v1, 0.0 }
 0x1fd   : > { %592 = vst [vmem:[%s1049_s25 + $0x18] sm:$0xff] %v584_v4  ;;  %596 = vst [vmem:[%s1049_s25 + $0x38] sm:$0xff] %v588_v5 }
 0x1fe PF: > { %s14_s19 = sadd.s32 1, %s858_s19   ;;  %s1079_s15 = smov %s850_s17 }
 0x1ff   : > { %p11_p7 = scmp.ge.s32.totalorder %s14_s19, 6   ;;  %s1080_s16 = smov %s854_s18 }
 0x200   : > { %s1081_s17 = smov %s1084_s20  ;;  %s1082_s18 = smov %s1088_s21 }
 0x201   :  { %13 = sbr.rel (!%p11_p7) target bundleno = 3 (0x3), region = 66 }

</bundles_post_ra>
